<compile_context>
chip_gen: v5e
topology: v5e:2x2
jax: 0.10.0
libtpu: 0.0.40
codegen_flags: <defaults>
</compile_context>

<pallas_src>
import functools

import jax
import jax.numpy as jnp
from jax.experimental import pallas as pl
from jax.experimental.pallas import tpu as pltpu

HIDDEN = 32                    # nn.RNN hidden_size
NUM_LAYERS = 3                 # nn.RNN num_layers
D2 = 2 * HIDDEN                # 64 = concat(fwd, bwd) width
SEQ = 3                        # implied by x.view(-1, 3*32*2)
IN_FEAT = 1                    # nn.RNN input_size
FEAT = SEQ * D2                # 192, fc1 fan-in
FC2 = 16
MATMUL_DTYPE = jnp.bfloat16


def rnn_mlp_kernel(x_ref, w0_ref, wih_ref, whh_ref, brnn_ref,
                   w1_ref, b1_ref, w2_ref, b2_ref, w3_ref, b3_ref,
                   out_ref, buf_a, buf_b):
    x = x_ref[...]                                    # (bt, SEQ) f32
    bufs = (buf_a, buf_b)

    for layer in range(NUM_LAYERS):
        dst = bufs[layer % 2]                         # ping-pong layer buffers (no copies)
        src = bufs[(layer + 1) % 2]
        whh = whh_ref[layer]                          # (64, 64) bf16 block_diag(fwd^T, bwd^T)

        # Whole-layer input projection (+ bias); permutations absorbed in the weights:
        # column block s of `proj` is xin_s = [fwd-proj(t=s) | bwd-proj(t=SEQ-1-s)].
        if layer == 0:
            w0 = w0_ref[...]                          # (SEQ, 192) f32; input_size==1 -> rank-1
            proj = brnn_ref[0] + x[:, 0:1] * w0[0:1, :]
            for t in range(1, SEQ):
                proj = proj + x[:, t:t + 1] * w0[t:t + 1, :]
        else:
            proj = jnp.dot(src[...].astype(MATMUL_DTYPE), wih_ref[layer - 1],
                           preferred_element_type=jnp.float32) + brnn_ref[layer]

        # Fused fwd/bwd recurrence in "step" layout: step s holds
        # [h_fwd(t=s) | h_bwd(t=SEQ-1-s)]; one contiguous 64-lane store per step.
        h = jnp.tanh(proj[:, 0:D2])                   # h0 == 0 -> skip the dead matmul
        dst[:, 0:D2] = h
        for s in range(1, SEQ):
            h = jnp.tanh(proj[:, s * D2:(s + 1) * D2]
                         + jnp.dot(h.astype(MATMUL_DTYPE), whh,
                                   preferred_element_type=jnp.float32))
            dst[:, s * D2:(s + 1) * D2] = h

    final = bufs[(NUM_LAYERS - 1) % 2]
    feat = jnp.maximum(final[...], 0.0)               # relu(RNN out) == relu then view(-1,192)
    h1 = jnp.maximum(jnp.dot(feat.astype(MATMUL_DTYPE), w1_ref[...],
                             preferred_element_type=jnp.float32) + b1_ref[...], 0.0)
    h2 = jnp.maximum(jnp.dot(h1.astype(MATMUL_DTYPE), w2_ref[...],
                             preferred_element_type=jnp.float32) + b2_ref[...], 0.0)
    # fc3 (fan-out 1) as an NT matmul -> lane-dense (1, bt) result row.
    y = jax.lax.dot_general(w3_ref[...], h2, (((1,), (1,)), ((), ())),
                            preferred_element_type=jnp.float32) + b3_ref[...]
    out_ref[...] = y.astype(out_ref.dtype)            # (1, bt)


def init_raw_params(key):
    """PyTorch-default init for RNN(1, 32, 3, bidirectional=True) + fc1/fc2/fc3."""
    ks = iter(jax.random.split(key, 4 * 2 * NUM_LAYERS + 6))
    u = lambda k, shape, bound: jax.random.uniform(k, shape, jnp.float32, -bound, bound)
    kr = 1.0 / float(HIDDEN) ** 0.5
    rnn = []
    for layer in range(NUM_LAYERS):
        in_size = IN_FEAT if layer == 0 else D2
        dirs = []
        for _d in range(2):                           # 0 = forward, 1 = backward
            dirs.append(dict(w_ih=u(next(ks), (HIDDEN, in_size), kr),
                             w_hh=u(next(ks), (HIDDEN, HIDDEN), kr),
                             b_ih=u(next(ks), (HIDDEN,), kr),
                             b_hh=u(next(ks), (HIDDEN,), kr)))
        rnn.append(dirs)
    k1 = 1.0 / float(FEAT) ** 0.5
    w1 = u(next(ks), (HIDDEN, FEAT), k1); b1 = u(next(ks), (HIDDEN,), k1)
    k2 = 1.0 / float(HIDDEN) ** 0.5
    w2 = u(next(ks), (FC2, HIDDEN), k2); b2 = u(next(ks), (FC2,), k2)
    k3 = 1.0 / float(FC2) ** 0.5
    w3 = u(next(ks), (1, FC2), k3); b3 = u(next(ks), (1,), k3)
    return dict(rnn=rnn, w1=w1, b1=b1, w2=w2, b2=b2, w3=w3, b3=b3)


def pack_params(raw):
    """Repack PyTorch-layout weights into the kernel's permutation-absorbed layout."""
    rnn = raw['rnn']

    # layer-0 rank-1 input projection, step layout: row t scales x[:, t].
    w0 = jnp.zeros((SEQ, FEAT), jnp.float32)
    for s in range(SEQ):
        tb = SEQ - 1 - s
        w0 = w0.at[s,  s * D2:s * D2 + HIDDEN].set(rnn[0][0]['w_ih'][:, 0])
        w0 = w0.at[tb, s * D2 + HIDDEN:(s + 1) * D2].set(rnn[0][1]['w_ih'][:, 0])

    # layers >= 1: fused (192,192) projection, step layout on both sides.
    wih = jnp.zeros((NUM_LAYERS - 1, FEAT, FEAT), jnp.float32)
    for layer in range(1, NUM_LAYERS):
        wf = rnn[layer][0]['w_ih']                    # (32, 64)
        wb = rnn[layer][1]['w_ih']                    # (32, 64)
        m = jnp.zeros((FEAT, FEAT), jnp.float32)
        for s in range(SEQ):
            tb = SEQ - 1 - s
            m = m.at[s * D2:s * D2 + HIDDEN,           s * D2:s * D2 + HIDDEN].set(wf[:, :HIDDEN].T)
            m = m.at[tb * D2 + HIDDEN:(tb + 1) * D2,   s * D2:s * D2 + HIDDEN].set(wf[:, HIDDEN:].T)
            m = m.at[tb * D2:tb * D2 + HIDDEN,         s * D2 + HIDDEN:(s + 1) * D2].set(wb[:, :HIDDEN].T)
            m = m.at[s * D2 + HIDDEN:(s + 1) * D2,     s * D2 + HIDDEN:(s + 1) * D2].set(wb[:, HIDDEN:].T)
        wih = wih.at[layer - 1].set(m)

    # recurrent weights (block-diagonal fwd/bwd) and per-step bias blocks.
    whh = jnp.zeros((NUM_LAYERS, D2, D2), jnp.float32)
    brnn = jnp.zeros((NUM_LAYERS, 1, FEAT), jnp.float32)
    for layer in range(NUM_LAYERS):
        whh = whh.at[layer, :HIDDEN, :HIDDEN].set(rnn[layer][0]['w_hh'].T)
        whh = whh.at[layer, HIDDEN:, HIDDEN:].set(rnn[layer][1]['w_hh'].T)
        bcat = jnp.concatenate([rnn[layer][0]['b_ih'] + rnn[layer][0]['b_hh'],
                                rnn[layer][1]['b_ih'] + rnn[layer][1]['b_hh']])
        brnn = brnn.at[layer, 0].set(jnp.tile(bcat, SEQ))

    # fc1 with the step->time permutation absorbed into its rows.
    perm = jnp.array([r if (r % D2) < HIDDEN else (SEQ - 1 - r // D2) * D2 + (r % D2)
                      for r in range(FEAT)], jnp.int32)
    w1 = raw['w1'].T[perm, :]                         # (FEAT, HIDDEN)

    return dict(
        w0=w0,                                        # f32 (VPU path)
        wih=wih.astype(MATMUL_DTYPE),
        whh=whh.astype(MATMUL_DTYPE),
        brnn=brnn,
        w1=w1.astype(MATMUL_DTYPE), b1=raw['b1'].reshape(1, HIDDEN),
        w2=raw['w2'].T.astype(MATMUL_DTYPE), b2=raw['b2'].reshape(1, FC2),
        w3=raw['w3'].astype(jnp.float32),             # (1, 16) row for the NT fc3 matmul
        b3=raw['b3'].reshape(1, 1))


def _round_up(n, m):
    return (n + m - 1) // m * m


@functools.partial(jax.jit, static_argnames=("block_b",))
def rnn_forward(x, params, *, block_b=1024):
    """x: (B, SEQ, 1) or (B, SEQ) float32 (batch_first, like the PyTorch module)."""
    if x.ndim == 3:
        x = x[..., 0]
    B = x.shape[0]
    bt = min(block_b, _round_up(B, 8))                # batch tile, multiple of 8 sublanes
    if bt == _round_up(B, 8) and bt > 512:
        # Large single-tile batch: split into >= 2 grid steps so the ("parallel",)
        # axis can shard across v7x's two TensorCores (no-op on single-TC v5e/v6e).
        bt = _round_up((B + 1) // 2, 8)
    Bp = _round_up(B, bt)
    if Bp != B:
        x = jnp.pad(x, ((0, Bp - B), (0, 0)))
    nb = Bp // bt

    def const_spec(shape):                            # constant index -> VMEM-resident weight
        n = len(shape)
        return pl.BlockSpec(shape, lambda i, _n=n: (0,) * _n)

    flops_row = (SEQ * 2 * FEAT
                 + (NUM_LAYERS - 1) * 2 * FEAT * FEAT
                 + NUM_LAYERS * (SEQ - 1) * 2 * D2 * D2
                 + 2 * FEAT * HIDDEN + 2 * HIDDEN * FC2 + 2 * FC2)
    wbytes = sum(int(v.size) * v.dtype.itemsize for v in params.values())
    cost = pl.CostEstimate(
        flops=int(Bp) * flops_row,
        transcendentals=int(Bp) * NUM_LAYERS * SEQ * D2,
        bytes_accessed=4 * int(Bp) * (SEQ + 1) + wbytes)

    out = pl.pallas_call(
        rnn_mlp_kernel,
        out_shape=jax.ShapeDtypeStruct((nb, 1, bt), jnp.float32),
        grid_spec=pltpu.PrefetchScalarGridSpec(
            num_scalar_prefetch=0,
            grid=(nb,),
            in_specs=[
                pl.BlockSpec((bt, SEQ), lambda i: (i, 0)),        # x (only per-batch input)
                const_spec((SEQ, FEAT)),                          # layer-0 rank-1 proj rows
                const_spec((NUM_LAYERS - 1, FEAT, FEAT)),         # fused proj, layers >= 1
                const_spec((NUM_LAYERS, D2, D2)),                 # w_hh block-diagonal
                const_spec((NUM_LAYERS, 1, FEAT)),                # (b_ih + b_hh) per step block
                const_spec((FEAT, HIDDEN)), const_spec((1, HIDDEN)),   # fc1 (rows permuted)
                const_spec((HIDDEN, FC2)), const_spec((1, FC2)),       # fc2
                const_spec((1, FC2)), const_spec((1, 1)),              # fc3 row + bias
            ],
            out_specs=pl.BlockSpec((None, 1, bt), lambda i: (i, 0, 0)),  # lane-dense rows
            scratch_shapes=[pltpu.VMEM((bt, FEAT), jnp.float32),
                            pltpu.VMEM((bt, FEAT), jnp.float32)]),
        compiler_params=pltpu.CompilerParams(
            dimension_semantics=("parallel",),
            vmem_limit_bytes=32 * 1024 * 1024),
        cost_estimate=cost,
    )(x, params['w0'], params['wih'], params['whh'], params['brnn'],
      params['w1'], params['b1'], params['w2'], params['b2'],
      params['w3'], params['b3'])
    return out.reshape(-1)[:B][:, None]


def reference(x, raw):
    """Pure-JAX f32 reference mirroring the PyTorch module. x: (B, SEQ)."""
    B = x.shape[0]
    inp = x[..., None]                                # (B, SEQ, 1)
    outs = None
    for layer in range(NUM_LAYERS):
        outs = jnp.zeros((B, SEQ, D2), jnp.float32)
        for d in range(2):
            p = raw['rnn'][layer][d]
            h = jnp.zeros((B, HIDDEN), jnp.float32)
            order = range(SEQ) if d == 0 else range(SEQ - 1, -1, -1)
            for t in order:
                h = jnp.tanh(inp[:, t] @ p['w_ih'].T + p['b_ih'] + h @ p['w_hh'].T + p['b_hh'])
                outs = outs.at[:, t, d * HIDDEN:(d + 1) * HIDDEN].set(h)
        inp = outs
    feat = jnp.maximum(outs, 0.0).reshape(B, FEAT)    # relu then view(-1, 3*32*2)
    h1 = jnp.maximum(feat @ raw['w1'].T + raw['b1'], 0.0)
    h2 = jnp.maximum(h1 @ raw['w2'].T + raw['b2'], 0.0)
    return h2 @ raw['w3'].T + raw['b3']


if __name__ == "__main__":
    key = jax.random.PRNGKey(0)
    k_param, k_x = jax.random.split(key)
    raw = init_raw_params(k_param)
    params = pack_params(raw)

    # small test, single grid block
    B = 8
    x = jax.random.normal(k_x, (B, SEQ, IN_FEAT), dtype=jnp.float32)
    out = jax.block_until_ready(rnn_forward(x, params))
    assert out.shape == (B, 1), out.shape
    ref = reference(x[..., 0], raw)
    assert jnp.allclose(out, ref, atol=2e-2, rtol=2e-2), float(jnp.max(jnp.abs(out - ref)))

    # exercise the batch grid (multiple blocks + batch padding)
    B2 = 20
    x2 = jax.random.normal(jax.random.PRNGKey(1), (B2, SEQ, IN_FEAT), dtype=jnp.float32)
    out2 = jax.block_until_ready(rnn_forward(x2, params, block_b=8))
    assert out2.shape == (B2, 1), out2.shape
    ref2 = reference(x2[..., 0], raw)
    assert jnp.allclose(out2, ref2, atol=2e-2, rtol=2e-2), float(jnp.max(jnp.abs(out2 - ref2)))

    print("KERNEL_OK")
</pallas_src>

<mosaic_0001>
module attributes {stable_mosaic.version = 11 : i64} {
  func.func @rnn_mlp_kernel(%arg0: i32, %arg1: memref<8x3xf32, #tpu.memory_space<vmem>>, %arg2: memref<3x192xf32, #tpu.memory_space<vmem>>, %arg3: memref<2x192x192xbf16, #tpu.memory_space<vmem>>, %arg4: memref<3x64x64xbf16, #tpu.memory_space<vmem>>, %arg5: memref<3x1x192xf32, #tpu.memory_space<vmem>>, %arg6: memref<192x32xbf16, #tpu.memory_space<vmem>>, %arg7: memref<1x32xf32, #tpu.memory_space<vmem>>, %arg8: memref<32x16xbf16, #tpu.memory_space<vmem>>, %arg9: memref<1x16xf32, #tpu.memory_space<vmem>>, %arg10: memref<1x16xf32, #tpu.memory_space<vmem>>, %arg11: memref<1x1xf32, #tpu.memory_space<vmem>>, %arg12: memref<1x1x8xf32, #tpu.memory_space<vmem>>, %arg13: memref<8x192xf32, #tpu.memory_space<vmem>>, %arg14: memref<8x192xf32, #tpu.memory_space<vmem>>) attributes {dimension_semantics = [#tpu.dimension_semantics<parallel>], iteration_bounds = array<i64: 1>, scalar_prefetch = 0 : i64, scratch_operands = 2 : i64, tpu.core_type = #tpu.core_type<tc>, window_params = [{transform_indices = @transform_0, window_bounds = array<i64: 8, 3>}, {pipeline_mode = #tpu.pipeline_mode<synchronous>, transform_indices = @transform_1, window_bounds = array<i64: 3, 192>}, {pipeline_mode = #tpu.pipeline_mode<synchronous>, transform_indices = @transform_2, window_bounds = array<i64: 2, 192, 192>}, {pipeline_mode = #tpu.pipeline_mode<synchronous>, transform_indices = @transform_3, window_bounds = array<i64: 3, 64, 64>}, {pipeline_mode = #tpu.pipeline_mode<synchronous>, transform_indices = @transform_4, window_bounds = array<i64: 3, 1, 192>}, {pipeline_mode = #tpu.pipeline_mode<synchronous>, transform_indices = @transform_5, window_bounds = array<i64: 192, 32>}, {pipeline_mode = #tpu.pipeline_mode<synchronous>, transform_indices = @transform_6, window_bounds = array<i64: 1, 32>}, {pipeline_mode = #tpu.pipeline_mode<synchronous>, transform_indices = @transform_7, window_bounds = array<i64: 32, 16>}, {pipeline_mode = #tpu.pipeline_mode<synchronous>, transform_indices = @transform_8, window_bounds = array<i64: 1, 16>}, {pipeline_mode = #tpu.pipeline_mode<synchronous>, transform_indices = @transform_9, window_bounds = array<i64: 1, 16>}, {pipeline_mode = #tpu.pipeline_mode<synchronous>, transform_indices = @transform_10, window_bounds = array<i64: 1, 1>}, {transform_indices = @transform_11, window_bounds = array<i64: 1, 1, 8>}]} {
    %c0 = arith.constant 0 : index
    %c0_0 = arith.constant 0 : index
    %0 = vector.load %arg1[%c0, %c0_0] : memref<8x3xf32, #tpu.memory_space<vmem>>, vector<8x3xf32>
    %c0_1 = arith.constant 0 : index
    %c0_2 = arith.constant 0 : index
    %c0_3 = arith.constant 0 : index
    %1 = vector.load %arg4[%c0_1, %c0_2, %c0_3] : memref<3x64x64xbf16, #tpu.memory_space<vmem>>, vector<1x64x64xbf16>
    %2 = vector.shape_cast %1 : vector<1x64x64xbf16> to vector<64x64xbf16>
    %c0_4 = arith.constant 0 : index
    %c0_5 = arith.constant 0 : index
    %3 = vector.load %arg2[%c0_4, %c0_5] : memref<3x192xf32, #tpu.memory_space<vmem>>, vector<3x192xf32>
    %c0_6 = arith.constant 0 : index
    %c0_7 = arith.constant 0 : index
    %c0_8 = arith.constant 0 : index
    %4 = vector.load %arg5[%c0_6, %c0_7, %c0_8] : memref<3x1x192xf32, #tpu.memory_space<vmem>>, vector<1x1x192xf32>
    %5 = vector.shape_cast %4 : vector<1x1x192xf32> to vector<1x192xf32>
    %6 = vector.extract_strided_slice %0 {offsets = [0, 0], sizes = [8, 1], strides = [1, 1]} : vector<8x3xf32> to vector<8x1xf32>
    %7 = vector.extract_strided_slice %3 {offsets = [0, 0], sizes = [1, 192], strides = [1, 1]} : vector<3x192xf32> to vector<1x192xf32>
    %8 = vector.broadcast %6 : vector<8x1xf32> to vector<8x192xf32>
    %9 = vector.broadcast %7 : vector<1x192xf32> to vector<8x192xf32>
    %10 = arith.mulf %8, %9 : vector<8x192xf32>
    %11 = vector.broadcast %5 : vector<1x192xf32> to vector<8x192xf32>
    %12 = arith.addf %11, %10 : vector<8x192xf32>
    %13 = vector.extract_strided_slice %0 {offsets = [0, 1], sizes = [8, 1], strides = [1, 1]} : vector<8x3xf32> to vector<8x1xf32>
    %14 = vector.extract_strided_slice %3 {offsets = [1, 0], sizes = [1, 192], strides = [1, 1]} : vector<3x192xf32> to vector<1x192xf32>
    %15 = vector.broadcast %13 : vector<8x1xf32> to vector<8x192xf32>
    %16 = vector.broadcast %14 : vector<1x192xf32> to vector<8x192xf32>
    %17 = arith.mulf %15, %16 : vector<8x192xf32>
    %18 = arith.addf %12, %17 : vector<8x192xf32>
    %19 = vector.extract_strided_slice %0 {offsets = [0, 2], sizes = [8, 1], strides = [1, 1]} : vector<8x3xf32> to vector<8x1xf32>
    %20 = vector.extract_strided_slice %3 {offsets = [2, 0], sizes = [1, 192], strides = [1, 1]} : vector<3x192xf32> to vector<1x192xf32>
    %21 = vector.broadcast %19 : vector<8x1xf32> to vector<8x192xf32>
    %22 = vector.broadcast %20 : vector<1x192xf32> to vector<8x192xf32>
    %23 = arith.mulf %21, %22 : vector<8x192xf32>
    %24 = arith.addf %18, %23 : vector<8x192xf32>
    %25 = vector.extract_strided_slice %24 {offsets = [0, 0], sizes = [8, 64], strides = [1, 1]} : vector<8x192xf32> to vector<8x64xf32>
    %26 = math.tanh %25 : vector<8x64xf32>
    %c0_9 = arith.constant 0 : index
    %c0_10 = arith.constant 0 : index
    %27 = vector.load %arg13[%c0_9, %c0_10] : memref<8x192xf32, #tpu.memory_space<vmem>>, vector<8x64xf32>
    tpu.vector_store %arg13[%c0_9, %c0_10], %26 {strides = array<i32>} : memref<8x192xf32, #tpu.memory_space<vmem>>, vector<8x64xf32>,
    %28 = vector.extract_strided_slice %24 {offsets = [0, 64], sizes = [8, 64], strides = [1, 1]} : vector<8x192xf32> to vector<8x64xf32>
    %29 = arith.truncf %26 : vector<8x64xf32> to vector<8x64xbf16>
    %cst = arith.constant dense<0.000000e+00> : vector<8x64xf32>
    %30 = tpu.matmul %29, %2, %cst {dimension_numbers = #tpu.dot_dimension_numbers<[1], [0], [0], [1], [0, 0, 1, 1], [], []>} : vector<8x64xbf16>, vector<64x64xbf16>, vector<8x64xf32> -> vector<8x64xf32>
    %31 = arith.addf %28, %30 : vector<8x64xf32>
    %32 = math.tanh %31 : vector<8x64xf32>
    %c0_11 = arith.constant 0 : index
    %c64 = arith.constant 64 : index
    %33 = vector.load %arg13[%c0_11, %c64] : memref<8x192xf32, #tpu.memory_space<vmem>>, vector<8x64xf32>
    tpu.vector_store %arg13[%c0_11, %c64], %32 {strides = array<i32>} : memref<8x192xf32, #tpu.memory_space<vmem>>, vector<8x64xf32>,
    %34 = vector.extract_strided_slice %24 {offsets = [0, 128], sizes = [8, 64], strides = [1, 1]} : vector<8x192xf32> to vector<8x64xf32>
    %35 = arith.truncf %32 : vector<8x64xf32> to vector<8x64xbf16>
    %cst_12 = arith.constant dense<0.000000e+00> : vector<8x64xf32>
    %36 = tpu.matmul %35, %2, %cst_12 {dimension_numbers = #tpu.dot_dimension_numbers<[1], [0], [0], [1], [0, 0, 1, 1], [], []>} : vector<8x64xbf16>, vector<64x64xbf16>, vector<8x64xf32> -> vector<8x64xf32>
    %37 = arith.addf %34, %36 : vector<8x64xf32>
    %38 = math.tanh %37 : vector<8x64xf32>
    %c0_13 = arith.constant 0 : index
    %c128 = arith.constant 128 : index
    %39 = vector.load %arg13[%c0_13, %c128] : memref<8x192xf32, #tpu.memory_space<vmem>>, vector<8x64xf32>
    tpu.vector_store %arg13[%c0_13, %c128], %38 {strides = array<i32>} : memref<8x192xf32, #tpu.memory_space<vmem>>, vector<8x64xf32>,
    %c1 = arith.constant 1 : index
    %c0_14 = arith.constant 0 : index
    %c0_15 = arith.constant 0 : index
    %40 = vector.load %arg4[%c1, %c0_14, %c0_15] : memref<3x64x64xbf16, #tpu.memory_space<vmem>>, vector<1x64x64xbf16>
    %41 = vector.shape_cast %40 : vector<1x64x64xbf16> to vector<64x64xbf16>
    %c0_16 = arith.constant 0 : index
    %c0_17 = arith.constant 0 : index
    %42 = vector.load %arg13[%c0_16, %c0_17] : memref<8x192xf32, #tpu.memory_space<vmem>>, vector<8x192xf32>
    %43 = arith.truncf %42 : vector<8x192xf32> to vector<8x192xbf16>
    %c0_18 = arith.constant 0 : index
    %c0_19 = arith.constant 0 : index
    %c0_20 = arith.constant 0 : index
    %44 = vector.load %arg3[%c0_18, %c0_19, %c0_20] : memref<2x192x192xbf16, #tpu.memory_space<vmem>>, vector<1x192x192xbf16>
    %45 = vector.shape_cast %44 : vector<1x192x192xbf16> to vector<192x192xbf16>
    %cst_21 = arith.constant dense<0.000000e+00> : vector<8x192xf32>
    %46 = tpu.matmul %43, %45, %cst_21 {dimension_numbers = #tpu.dot_dimension_numbers<[1], [0], [0], [1], [0, 0, 1, 1], [], []>} : vector<8x192xbf16>, vector<192x192xbf16>, vector<8x192xf32> -> vector<8x192xf32>
    %c1_22 = arith.constant 1 : index
    %c0_23 = arith.constant 0 : index
    %c0_24 = arith.constant 0 : index
    %47 = vector.load %arg5[%c1_22, %c0_23, %c0_24] : memref<3x1x192xf32, #tpu.memory_space<vmem>>, vector<1x1x192xf32>
    %48 = vector.shape_cast %47 : vector<1x1x192xf32> to vector<1x192xf32>
    %49 = vector.broadcast %48 : vector<1x192xf32> to vector<8x192xf32>
    %50 = arith.addf %46, %49 : vector<8x192xf32>
    %51 = vector.extract_strided_slice %50 {offsets = [0, 0], sizes = [8, 64], strides = [1, 1]} : vector<8x192xf32> to vector<8x64xf32>
    %52 = math.tanh %51 : vector<8x64xf32>
    %c0_25 = arith.constant 0 : index
    %c0_26 = arith.constant 0 : index
    %53 = vector.load %arg14[%c0_25, %c0_26] : memref<8x192xf32, #tpu.memory_space<vmem>>, vector<8x64xf32>
    tpu.vector_store %arg14[%c0_25, %c0_26], %52 {strides = array<i32>} : memref<8x192xf32, #tpu.memory_space<vmem>>, vector<8x64xf32>,
    %54 = vector.extract_strided_slice %50 {offsets = [0, 64], sizes = [8, 64], strides = [1, 1]} : vector<8x192xf32> to vector<8x64xf32>
    %55 = arith.truncf %52 : vector<8x64xf32> to vector<8x64xbf16>
    %cst_27 = arith.constant dense<0.000000e+00> : vector<8x64xf32>
    %56 = tpu.matmul %55, %41, %cst_27 {dimension_numbers = #tpu.dot_dimension_numbers<[1], [0], [0], [1], [0, 0, 1, 1], [], []>} : vector<8x64xbf16>, vector<64x64xbf16>, vector<8x64xf32> -> vector<8x64xf32>
    %57 = arith.addf %54, %56 : vector<8x64xf32>
    %58 = math.tanh %57 : vector<8x64xf32>
    %c0_28 = arith.constant 0 : index
    %c64_29 = arith.constant 64 : index
    %59 = vector.load %arg14[%c0_28, %c64_29] : memref<8x192xf32, #tpu.memory_space<vmem>>, vector<8x64xf32>
    tpu.vector_store %arg14[%c0_28, %c64_29], %58 {strides = array<i32>} : memref<8x192xf32, #tpu.memory_space<vmem>>, vector<8x64xf32>,
    %60 = vector.extract_strided_slice %50 {offsets = [0, 128], sizes = [8, 64], strides = [1, 1]} : vector<8x192xf32> to vector<8x64xf32>
    %61 = arith.truncf %58 : vector<8x64xf32> to vector<8x64xbf16>
    %cst_30 = arith.constant dense<0.000000e+00> : vector<8x64xf32>
    %62 = tpu.matmul %61, %41, %cst_30 {dimension_numbers = #tpu.dot_dimension_numbers<[1], [0], [0], [1], [0, 0, 1, 1], [], []>} : vector<8x64xbf16>, vector<64x64xbf16>, vector<8x64xf32> -> vector<8x64xf32>
    %63 = arith.addf %60, %62 : vector<8x64xf32>
    %64 = math.tanh %63 : vector<8x64xf32>
    %c0_31 = arith.constant 0 : index
    %c128_32 = arith.constant 128 : index
    %65 = vector.load %arg14[%c0_31, %c128_32] : memref<8x192xf32, #tpu.memory_space<vmem>>, vector<8x64xf32>
    tpu.vector_store %arg14[%c0_31, %c128_32], %64 {strides = array<i32>} : memref<8x192xf32, #tpu.memory_space<vmem>>, vector<8x64xf32>,
    %c2 = arith.constant 2 : index
    %c0_33 = arith.constant 0 : index
    %c0_34 = arith.constant 0 : index
    %66 = vector.load %arg4[%c2, %c0_33, %c0_34] : memref<3x64x64xbf16, #tpu.memory_space<vmem>>, vector<1x64x64xbf16>
    %67 = vector.shape_cast %66 : vector<1x64x64xbf16> to vector<64x64xbf16>
    %c0_35 = arith.constant 0 : index
    %c0_36 = arith.constant 0 : index
    %68 = vector.load %arg14[%c0_35, %c0_36] : memref<8x192xf32, #tpu.memory_space<vmem>>, vector<8x192xf32>
    %69 = arith.truncf %68 : vector<8x192xf32> to vector<8x192xbf16>
    %c1_37 = arith.constant 1 : index
    %c0_38 = arith.constant 0 : index
    %c0_39 = arith.constant 0 : index
    %70 = vector.load %arg3[%c1_37, %c0_38, %c0_39] : memref<2x192x192xbf16, #tpu.memory_space<vmem>>, vector<1x192x192xbf16>
    %71 = vector.shape_cast %70 : vector<1x192x192xbf16> to vector<192x192xbf16>
    %cst_40 = arith.constant dense<0.000000e+00> : vector<8x192xf32>
    %72 = tpu.matmul %69, %71, %cst_40 {dimension_numbers = #tpu.dot_dimension_numbers<[1], [0], [0], [1], [0, 0, 1, 1], [], []>} : vector<8x192xbf16>, vector<192x192xbf16>, vector<8x192xf32> -> vector<8x192xf32>
    %c2_41 = arith.constant 2 : index
    %c0_42 = arith.constant 0 : index
    %c0_43 = arith.constant 0 : index
    %73 = vector.load %arg5[%c2_41, %c0_42, %c0_43] : memref<3x1x192xf32, #tpu.memory_space<vmem>>, vector<1x1x192xf32>
    %74 = vector.shape_cast %73 : vector<1x1x192xf32> to vector<1x192xf32>
    %75 = vector.broadcast %74 : vector<1x192xf32> to vector<8x192xf32>
    %76 = arith.addf %72, %75 : vector<8x192xf32>
    %77 = vector.extract_strided_slice %76 {offsets = [0, 0], sizes = [8, 64], strides = [1, 1]} : vector<8x192xf32> to vector<8x64xf32>
    %78 = math.tanh %77 : vector<8x64xf32>
    %c0_44 = arith.constant 0 : index
    %c0_45 = arith.constant 0 : index
    %79 = vector.load %arg13[%c0_44, %c0_45] : memref<8x192xf32, #tpu.memory_space<vmem>>, vector<8x64xf32>
    tpu.vector_store %arg13[%c0_44, %c0_45], %78 {strides = array<i32>} : memref<8x192xf32, #tpu.memory_space<vmem>>, vector<8x64xf32>,
    %80 = vector.extract_strided_slice %76 {offsets = [0, 64], sizes = [8, 64], strides = [1, 1]} : vector<8x192xf32> to vector<8x64xf32>
    %81 = arith.truncf %78 : vector<8x64xf32> to vector<8x64xbf16>
    %cst_46 = arith.constant dense<0.000000e+00> : vector<8x64xf32>
    %82 = tpu.matmul %81, %67, %cst_46 {dimension_numbers = #tpu.dot_dimension_numbers<[1], [0], [0], [1], [0, 0, 1, 1], [], []>} : vector<8x64xbf16>, vector<64x64xbf16>, vector<8x64xf32> -> vector<8x64xf32>
    %83 = arith.addf %80, %82 : vector<8x64xf32>
    %84 = math.tanh %83 : vector<8x64xf32>
    %c0_47 = arith.constant 0 : index
    %c64_48 = arith.constant 64 : index
    %85 = vector.load %arg13[%c0_47, %c64_48] : memref<8x192xf32, #tpu.memory_space<vmem>>, vector<8x64xf32>
    tpu.vector_store %arg13[%c0_47, %c64_48], %84 {strides = array<i32>} : memref<8x192xf32, #tpu.memory_space<vmem>>, vector<8x64xf32>,
    %86 = vector.extract_strided_slice %76 {offsets = [0, 128], sizes = [8, 64], strides = [1, 1]} : vector<8x192xf32> to vector<8x64xf32>
    %87 = arith.truncf %84 : vector<8x64xf32> to vector<8x64xbf16>
    %cst_49 = arith.constant dense<0.000000e+00> : vector<8x64xf32>
    %88 = tpu.matmul %87, %67, %cst_49 {dimension_numbers = #tpu.dot_dimension_numbers<[1], [0], [0], [1], [0, 0, 1, 1], [], []>} : vector<8x64xbf16>, vector<64x64xbf16>, vector<8x64xf32> -> vector<8x64xf32>
    %89 = arith.addf %86, %88 : vector<8x64xf32>
    %90 = math.tanh %89 : vector<8x64xf32>
    %c0_50 = arith.constant 0 : index
    %c128_51 = arith.constant 128 : index
    %91 = vector.load %arg13[%c0_50, %c128_51] : memref<8x192xf32, #tpu.memory_space<vmem>>, vector<8x64xf32>
    tpu.vector_store %arg13[%c0_50, %c128_51], %90 {strides = array<i32>} : memref<8x192xf32, #tpu.memory_space<vmem>>, vector<8x64xf32>,
    %c0_52 = arith.constant 0 : index
    %c0_53 = arith.constant 0 : index
    %92 = vector.load %arg13[%c0_52, %c0_53] : memref<8x192xf32, #tpu.memory_space<vmem>>, vector<8x192xf32>
    %cst_54 = arith.constant 0.000000e+00 : f32
    %93 = vector.broadcast %cst_54 : f32 to vector<8x192xf32>
    %94 = arith.maximumf %92, %93 : vector<8x192xf32>
    %95 = arith.truncf %94 : vector<8x192xf32> to vector<8x192xbf16>
    %c0_55 = arith.constant 0 : index
    %c0_56 = arith.constant 0 : index
    %96 = vector.load %arg6[%c0_55, %c0_56] : memref<192x32xbf16, #tpu.memory_space<vmem>>, vector<192x32xbf16>
    %cst_57 = arith.constant dense<0.000000e+00> : vector<8x32xf32>
    %97 = tpu.matmul %95, %96, %cst_57 {dimension_numbers = #tpu.dot_dimension_numbers<[1], [0], [0], [1], [0, 0, 1, 1], [], []>} : vector<8x192xbf16>, vector<192x32xbf16>, vector<8x32xf32> -> vector<8x32xf32>
    %c0_58 = arith.constant 0 : index
    %c0_59 = arith.constant 0 : index
    %98 = vector.load %arg7[%c0_58, %c0_59] : memref<1x32xf32, #tpu.memory_space<vmem>>, vector<1x32xf32>
    %99 = vector.broadcast %98 : vector<1x32xf32> to vector<8x32xf32>
    %100 = arith.addf %97, %99 : vector<8x32xf32>
    %cst_60 = arith.constant 0.000000e+00 : f32
    %101 = vector.broadcast %cst_60 : f32 to vector<8x32xf32>
    %102 = arith.maximumf %100, %101 : vector<8x32xf32>
    %103 = arith.truncf %102 : vector<8x32xf32> to vector<8x32xbf16>
    %c0_61 = arith.constant 0 : index
    %c0_62 = arith.constant 0 : index
    %104 = vector.load %arg8[%c0_61, %c0_62] : memref<32x16xbf16, #tpu.memory_space<vmem>>, vector<32x16xbf16>
    %cst_63 = arith.constant dense<0.000000e+00> : vector<8x16xf32>
    %105 = tpu.matmul %103, %104, %cst_63 {dimension_numbers = #tpu.dot_dimension_numbers<[1], [0], [0], [1], [0, 0, 1, 1], [], []>} : vector<8x32xbf16>, vector<32x16xbf16>, vector<8x16xf32> -> vector<8x16xf32>
    %c0_64 = arith.constant 0 : index
    %c0_65 = arith.constant 0 : index
    %106 = vector.load %arg9[%c0_64, %c0_65] : memref<1x16xf32, #tpu.memory_space<vmem>>, vector<1x16xf32>
    %107 = vector.broadcast %106 : vector<1x16xf32> to vector<8x16xf32>
    %108 = arith.addf %105, %107 : vector<8x16xf32>
    %cst_66 = arith.constant 0.000000e+00 : f32
    %109 = vector.broadcast %cst_66 : f32 to vector<8x16xf32>
    %110 = arith.maximumf %108, %109 : vector<8x16xf32>
    %c0_67 = arith.constant 0 : index
    %c0_68 = arith.constant 0 : index
    %111 = vector.load %arg10[%c0_67, %c0_68] : memref<1x16xf32, #tpu.memory_space<vmem>>, vector<1x16xf32>
    %cst_69 = arith.constant dense<0.000000e+00> : vector<1x8xf32>
    %112 = tpu.matmul %111, %110, %cst_69 {dimension_numbers = #tpu.dot_dimension_numbers<[1], [1], [0], [0], [0, 0, 1, 0], [], []>} : vector<1x16xf32>, vector<8x16xf32>, vector<1x8xf32> -> vector<1x8xf32>
    %c0_70 = arith.constant 0 : index
    %c0_71 = arith.constant 0 : index
    %113 = vector.load %arg11[%c0_70, %c0_71] : memref<1x1xf32, #tpu.memory_space<vmem>>, vector<1x1xf32>
    %114 = vector.broadcast %113 : vector<1x1xf32> to vector<1x8xf32>
    %115 = arith.addf %112, %114 : vector<1x8xf32>
    %c0_72 = arith.constant 0 : index
    %c0_73 = arith.constant 0 : index
    %c0_74 = arith.constant 0 : index
    %116 = vector.load %arg12[%c0_72, %c0_73, %c0_74] : memref<1x1x8xf32, #tpu.memory_space<vmem>>, vector<1x1x8xf32>
    %117 = vector.shape_cast %116 : vector<1x1x8xf32> to vector<1x8xf32>
    %118 = vector.shape_cast %115 : vector<1x8xf32> to vector<1x1x8xf32>
    tpu.vector_store %arg12[%c0_72, %c0_73, %c0_74], %118 {strides = array<i32>} : memref<1x1x8xf32, #tpu.memory_space<vmem>>, vector<1x1x8xf32>,
    return
  }
  func.func @transform_0(%arg0: i32) -> (i32, i32) {
    %c0_i32 = arith.constant 0 : i32
    %c0_i32_0 = arith.constant 0 : i32
    return %arg0, %c0_i32 : i32, i32
  }
  func.func @transform_1(%arg0: i32) -> (i32, i32) {
    %c0_i32 = arith.constant 0 : i32
    %c0_i32_0 = arith.constant 0 : i32
    %c0_i32_1 = arith.constant 0 : i32
    return %c0_i32, %c0_i32_0 : i32, i32
  }
  func.func @transform_2(%arg0: i32) -> (i32, i32, i32) {
    %c0_i32 = arith.constant 0 : i32
    %c0_i32_0 = arith.constant 0 : i32
    %c0_i32_1 = arith.constant 0 : i32
    %c0_i32_2 = arith.constant 0 : i32
    return %c0_i32, %c0_i32_0, %c0_i32_1 : i32, i32, i32
  }
  func.func @transform_3(%arg0: i32) -> (i32, i32, i32) {
    %c0_i32 = arith.constant 0 : i32
    %c0_i32_0 = arith.constant 0 : i32
    %c0_i32_1 = arith.constant 0 : i32
    %c0_i32_2 = arith.constant 0 : i32
    return %c0_i32, %c0_i32_0, %c0_i32_1 : i32, i32, i32
  }
  func.func @transform_4(%arg0: i32) -> (i32, i32, i32) {
    %c0_i32 = arith.constant 0 : i32
    %c0_i32_0 = arith.constant 0 : i32
    %c0_i32_1 = arith.constant 0 : i32
    %c0_i32_2 = arith.constant 0 : i32
    return %c0_i32, %c0_i32_0, %c0_i32_1 : i32, i32, i32
  }
  func.func @transform_5(%arg0: i32) -> (i32, i32) {
    %c0_i32 = arith.constant 0 : i32
    %c0_i32_0 = arith.constant 0 : i32
    %c0_i32_1 = arith.constant 0 : i32
    return %c0_i32, %c0_i32_0 : i32, i32
  }
  func.func @transform_6(%arg0: i32) -> (i32, i32) {
    %c0_i32 = arith.constant 0 : i32
    %c0_i32_0 = arith.constant 0 : i32
    %c0_i32_1 = arith.constant 0 : i32
    return %c0_i32, %c0_i32_0 : i32, i32
  }
  func.func @transform_7(%arg0: i32) -> (i32, i32) {
    %c0_i32 = arith.constant 0 : i32
    %c0_i32_0 = arith.constant 0 : i32
    %c0_i32_1 = arith.constant 0 : i32
    return %c0_i32, %c0_i32_0 : i32, i32
  }
  func.func @transform_8(%arg0: i32) -> (i32, i32) {
    %c0_i32 = arith.constant 0 : i32
    %c0_i32_0 = arith.constant 0 : i32
    %c0_i32_1 = arith.constant 0 : i32
    return %c0_i32, %c0_i32_0 : i32, i32
  }
  func.func @transform_9(%arg0: i32) -> (i32, i32) {
    %c0_i32 = arith.constant 0 : i32
    %c0_i32_0 = arith.constant 0 : i32
    %c0_i32_1 = arith.constant 0 : i32
    return %c0_i32, %c0_i32_0 : i32, i32
  }
  func.func @transform_10(%arg0: i32) -> (i32, i32) {
    %c0_i32 = arith.constant 0 : i32
    %c0_i32_0 = arith.constant 0 : i32
    %c0_i32_1 = arith.constant 0 : i32
    return %c0_i32, %c0_i32_0 : i32, i32
  }
  func.func @transform_11(%arg0: i32) -> (i32, i32, i32) {
    %c0_i32 = arith.constant 0 : i32
    %c0_i32_0 = arith.constant 0 : i32
    %c0_i32_1 = arith.constant 0 : i32
    return %arg0, %c0_i32, %c0_i32_0 : i32, i32, i32
  }
}

</mosaic_0001>

<bundles_post_ra>
// kernel: rnn_forward.1
= control target key start
LH: loop header
LB: loop body
LE: loop exit
PB: predicated region body
PF: predicated region fallthrough
CT: control target
= control target key end

     0   :  { %s1743_s0 = inlined_call_operand.vmem [shape: f32[8,3], index: 0, kind: input, shape index: {}]   ;;  %s1744_s1 = inlined_call_operand.vmem [shape: f32[3,192], index: 1, kind: input, shape index: {}]   ;;  %s1745_s2 = inlined_call_operand.hbm [shape: bf16[2,192,192], index: 2, kind: input, shape index: {}]   ;;  %s1746_s3 = inlined_call_operand.vmem [shape: bf16[3,64,64], index: 3, kind: input, shape index: {}]   ;;  %s1747_s4 = inlined_call_operand.vmem [shape: f32[3,1,192], index: 4, kind: input, shape index: {}]   ;;  %s1748_s5 = inlined_call_operand.vmem [shape: bf16[192,32], index: 5, kind: input, shape index: {}]   ;;  %s1749_s6 = inlined_call_operand.vmem [shape: f32[1,32], index: 6, kind: input, shape index: {}]   ;;  %s1750_s7 = inlined_call_operand.vmem [shape: bf16[32,16], index: 7, kind: input, shape index: {}]   ;;  %s1751_s8 = inlined_call_operand.vmem [shape: f32[1,16], index: 8, kind: input, shape index: {}]   ;;  %s1752_s9 = inlined_call_operand.vmem [shape: f32[1,16], index: 9, kind: input, shape index: {}]   ;;  %s1753_s10 = inlined_call_operand.<no memory space> [shape: f32[1,1], index: 10, kind: input, shape index: {}]   ;;  %s1754_s11 = inlined_call_operand.hbm [shape: f32[1,1,8], index: 11, kind: output, shape index: {}]  }
   0x1   :  { %v16_v0 = vstv %s1753_s10 }
   0x2   :  { %17 = vst [vmem:[#allocation4] sm:$0x1] %v16_v0 }
   0x3   :  { %18 = vsyncpa [#allocation6], 0 }
   0x4   :  { %19 = vsyncpa [#allocation7], 0  ;;  %s28_s21 = sshll.u32 %s1745_s2, 4  ;;  %s1494_s22 = smov [#allocation5]   ;;  %s29_s21 = int_to_ptr.hbm [resolvable:$true] %s28_s21 }
   0x5   :  { %s30_s23 = sshll.u32 %s1494_s22, 4  ;;  %s1495_s24 = smov 128   ;;  %s31_s23 = int_to_ptr.vmem [resolvable:$true] %s30_s23 }
   0x6   :  { %s1496_s25 = smov 8  }
   0x7   :  { %36 = dma.hbm_to_vmem [thread:$0]  %s29_s21, 6144, %s31_s23, [#allocation6], %s1495_s24, %s1495_s24, %s1496_s25  }
   0x8   :  { %1490 = dma.done.wait [#allocation6], 6144  }
   0x9   :  { %1491 = vsyncadd [#allocation6], 4294961152  ;;  %v1497_v1 = vmov 0   ;;  %v1498_v2 = vmov 2   ;;  %v58_v3 = vld [vmem:[%s1743_s0] sm:$0xff]  ;;  %v1499_v4 = vmov 1  }
   0xa   :  { %1417 = vset.pattern.permute.xlu0 %v1497_v1  ;;  %1419 = vset.pattern.permute.xlu1 %v1498_v2  ;;  %v1338_v5 = vld [vmem:[%s1746_s3 + $0x18] sm:$0xff]  ;;  %v1337_v6 = vld [vmem:[%s1746_s3 + $0x10] sm:$0xff]  ;;  %v1336_v7 = vld [vmem:[%s1746_s3 + $0x8] sm:$0xff]  ;;  %vm119_vm0 = vcmask 523264   ;;  %vm168_vm1 = vcmask 1048064   ;;  %vm935_vm2 = vcmask 261120  }
   0xb   :  { %71 = vperm.xlu0 %1417, %v58_v3   ;;  %105 = vperm.xlu1 %1419, %v58_v3   ;;  %v1335_v8 = vld [vmem:[%s1746_s3] sm:$0xff]  ;;  %v1092_v34 = vld [vmem:[#allocation5 + $0x70] sm:$0xf]  ;;  %v1358_v35 = vld [vmem:[#allocation5 + $0x74] sm:$0xf0]  ;;  %vm961_vm3 = vcmask 130048  }
   0xc   :  { %153 = vmatpush.bf16.msra.mxu0 %v1338_v5  ;;  %181 = vmatpush.bf16.msra.mxu1 %v1338_v5  ;;  %v1586_v9 = vld [vmem:[%s1744_s1] sm:$0x77]  ;;  %v1357_v36 = vld [vmem:[#allocation5 + $0x74] sm:$0xf]  ;;  %v1093_v37 = vor.u32 %v1358_v35, %v1092_v34  ;;  %v1356_v40 = vld [vmem:[#allocation5 + $0x64] sm:$0xf0] }
   0xd   :  { %v76_v10 = vperm.slane %v1586_v9, 4  ;;  %v68_v11 = vld [vmem:[%s1747_s4] sm:$0x3]  ;;  %v75_v13 = vperm.slane %v1586_v9, 0  ;;  %v94_v18 = vperm.slane %v1586_v9, 1  ;;  %v108_v19 = vperm.slane %v1586_v9, 2 }
   0xe   :  { %v85_v14 = vperm.slane %v68_v11, 1  ;;  %v84_v21 = vperm.slane %v68_v11, 0  ;;  %v1094_v38 = vld [vmem:[#allocation5 + $0x78] sm:$0xf0]  ;;  %v1084_v39 = vld [vmem:[#allocation5 + $0x60] sm:$0xf]  ;;  %360 = vmatpush.bf16.msra.mxu2 %v1093_v37 }
   0xf   :  { %v80_v12 = vperm.slane %v76_v10, 0  ;;  %v79_v17 = vperm.slane %v75_v13, 0  ;;  %v98_v23 = vperm.slane %v94_v18, 1  ;;  %v112_v24 = vperm.slane %v108_v19, 2  ;;  %v1355_v42 = vld [vmem:[#allocation5 + $0x64] sm:$0xf] }
  0x10   :  { %154 = vmatpush.bf16.msra.mxu0 %v1337_v6  ;;  %182 = vmatpush.bf16.msra.mxu1 %v1337_v6  ;;  %v1097_v41 = vor.u32 %v1357_v36, %v1094_v38  ;;  %v1086_v43 = vld [vmem:[#allocation5 + $0x68] sm:$0xf0]  ;;  %v1085_v44 = vor.u32 %v1356_v40, %v1084_v39  ;;  %v1076_v46 = vld [vmem:[#allocation5 + $0x50] sm:$0xf]  ;;  %v1354_v47 = vld [vmem:[#allocation5 + $0x54] sm:$0xf0] }
  0x11   :  { %v1089_v45 = vor.u32 %v1355_v42, %v1086_v43  ;;  %v1353_v48 = vld [vmem:[#allocation5 + $0x54] sm:$0xf]  ;;  %v1078_v49 = vld [vmem:[#allocation5 + $0x58] sm:$0xf0]  ;;  %v1077_v50 = vor.u32 %v1354_v47, %v1076_v46  ;;  %s1500_s1 = smov 64   ;;  %s1501_s20 = smov [#allocation8]  }
  0x12   :  { %361 = vmatpush.bf16.msra.mxu2 %v1085_v44  ;;  %v1081_v51 = vor.u32 %v1353_v48, %v1078_v49  ;;  %v1068_v54 = vld [vmem:[#allocation5 + $0x40] sm:$0xf]  ;;  %v1352_v55 = vld [vmem:[#allocation5 + $0x44] sm:$0xf0]  ;;  %v1351_v56 = vld [vmem:[#allocation5 + $0x44] sm:$0xf] }
  0x13   :  { %1418 = vset.pattern.permute.xlu0 %v1499_v4  ;;  %1420 = vset.pattern.permute.xlu1 %v1497_v1  ;;  %v1069_v57 = vor.u32 %v1352_v55, %v1068_v54  ;;  %v1070_v58 = vld [vmem:[#allocation5 + $0x48] sm:$0xf0]  ;;  %v1060_v60 = vld [vmem:[#allocation5 + $0x30] sm:$0xf]  ;;  %v1350_v61 = vld [vmem:[#allocation5 + $0x34] sm:$0xf0] }
  0x14   :  { %91 = vperm.xlu0 %1418, %v58_v3   ;;  %155 = vmatpush.bf16.msra.mxu0 %v1336_v7  ;;  %v1073_v59 = vor.u32 %v1351_v56, %v1070_v58  ;;  %v1349_v62 = vld [vmem:[#allocation5 + $0x34] sm:$0xf]  ;;  %v1061_v63 = vor.u32 %v1350_v61, %v1060_v60  ;;  %v1062_v0 = vld [vmem:[#allocation5 + $0x38] sm:$0xf0]  ;;  %v1052_v2 = vld [vmem:[#allocation5 + $0x20] sm:$0xf] }
  0x15   :  { %183 = vmatpush.bf16.msra.mxu1 %v1336_v7  ;;  %v1348_v3 = vld [vmem:[#allocation5 + $0x24] sm:$0xf0]  ;;  %v1347_v4 = vld [vmem:[#allocation5 + $0x24] sm:$0xf]  ;;  %v1054_v6 = vld [vmem:[#allocation5 + $0x28] sm:$0xf0] }
  0x16   :  { %362 = vmatpush.bf16.msra.mxu2 %v1077_v50  ;;  %v1053_v5 = vor.u32 %v1348_v3, %v1052_v2  ;;  %v1057_v7 = vor.u32 %v1347_v4, %v1054_v6  ;;  %v1346_v10 = vld [vmem:[#allocation5 + $0x14] sm:$0xf0]  ;;  %v1345_v11 = vld [vmem:[#allocation5 + $0x14] sm:$0xf]  ;;  %v1046_v13 = vld [vmem:[#allocation5 + $0x18] sm:$0xf0] }
  0x17   :  { %v1038_v19 = vld [vmem:[#allocation5 + $0x8] sm:$0xf0]  ;;  %v1124_v38 = vld [vmem:[#allocation5 + $0xb0] sm:$0xf]  ;;  %v1366_v39 = vld [vmem:[#allocation5 + $0xb4] sm:$0xf0] }
  0x18   :  { %156 = vmatpush.bf16.msra.mxu0 %v1335_v8  ;;  %v1365_v40 = vld [vmem:[#allocation5 + $0xb4] sm:$0xf]  ;;  %v1126_v42 = vld [vmem:[#allocation5 + $0xb8] sm:$0xf0]  ;;  %v1116_v44 = vld [vmem:[#allocation5 + $0xa0] sm:$0xf] }
  0x19   :  { %184 = vmatpush.bf16.msra.mxu1 %v1335_v8  ;;  %v1044_v8 = vld [vmem:[#allocation5 + $0x10] sm:$0xf]  ;;  %v1129_v43 = vor.u32 %v1365_v40, %v1126_v42  ;;  %v1363_v46 = vld [vmem:[#allocation5 + $0xa4] sm:$0xf]  ;;  %v1118_v48 = vld [vmem:[#allocation5 + $0xa8] sm:$0xf0] }
  0x1a   :  { %363 = vmatpush.bf16.msra.mxu2 %v1069_v57  ;;  %v1121_v49 = vor.u32 %v1363_v46, %v1118_v48  ;;  %v1108_v50 = vld [vmem:[#allocation5 + $0x90] sm:$0xf]  ;;  %v1110_v54 = vld [vmem:[#allocation5 + $0x98] sm:$0xf0]  ;;  %v1100_v55 = vld [vmem:[#allocation5 + $0x80] sm:$0xf] }
  0x1b   :  { %v1360_v56 = vld [vmem:[#allocation5 + $0x84] sm:$0xf0]  ;;  %v1359_v58 = vld [vmem:[#allocation5 + $0x84] sm:$0xf]  ;;  %v1381_v40 = vld [vmem:[#allocation5 + $0x114] sm:$0xf] }
  0x1c   :  { %1421 = vset.pattern.permute.xlu0 %v1497_v1  ;;  %386 = vmatpush.bf16.msrb.mxu0 %v1097_v41  ;;  %v1065_v1 = vor.u32 %v1349_v62, %v1062_v0  ;;  %v1125_v41 = vor.u32 %v1366_v39, %v1124_v38  ;;  %v1101_v60 = vor.u32 %v1360_v56, %v1100_v55  ;;  %v95_v62 = vperm.slane %v1586_v9, 5  ;;  %v1201_v38 = vld [vmem:[#allocation5 + $0x110] sm:$0xf]  ;;  %v1382_v39 = vld [vmem:[#allocation5 + $0x114] sm:$0xf0]  ;;  %s995_s21 = sshll.u32 %s1501_s20, 4  ;;  %s996_s21 = int_to_ptr.vmem [resolvable:$true] %s995_s21 }
  0x1d   :  { %403 = vmatpush.bf16.msrb.mxu1 %v1129_v43  ;;  %v109_v0 = vperm.slane %v1586_v9, 6  ;;  %v1342_v9 = vld [vmem:[%s1746_s3 + $0x38] sm:$0xff]  ;;  %v1202_v42 = vor.u32 %v1382_v39, %v1201_v38  ;;  %v1193_v46 = vld [vmem:[#allocation5 + $0x100] sm:$0xf]  ;;  %v1379_v48 = vld [vmem:[#allocation5 + $0x104] sm:$0xf] }
  0x1e   :  { %364 = vmatpush.bf16.msra.mxu2 %v1061_v63  ;;  %377 = vmatpush.bf16.msra.mxu3 %v1125_v41  ;;  %v99_v63 = vperm.slane %v95_v62, 1  ;;  %v1203_v41 = vld [vmem:[#allocation5 + $0x118] sm:$0xf0]  ;;  %v1179_v62 = vld [vmem:[#allocation5 + $0xe8] sm:$0xf0]  ;;  %s997_s24 = sshll.u32 %s1754_s11, 4  ;;  %s998_s24 = int_to_ptr.hbm [resolvable:$true] %s997_s24 }
  0x1f   :  { %v113_v2 = vperm.slane %v109_v0, 2  ;;  %v1206_v43 = vor.u32 %v1381_v40, %v1203_v41  ;;  %v1187_v56 = vld [vmem:[#allocation5 + $0xf8] sm:$0xf0]  ;;  %v1169_v0 = vld [vmem:[#allocation5 + $0xd0] sm:$0xf]  ;;  %vm988_vm4 = vcmask 57344  }
  0x20   :  { %387 = vmatpush.bf16.msrb.mxu0 %v1089_v45  ;;  %v1364_v45 = vld [vmem:[#allocation5 + $0xa4] sm:$0xf0]  ;;  %v1233_v39 = vld [vmem:[#allocation5 + $0x150] sm:$0xf]  ;;  %v1390_v40 = vld [vmem:[#allocation5 + $0x154] sm:$0xf0] }
  0x21   :  { %v1117_v47 = vor.u32 %v1364_v45, %v1116_v44  ;;  %404 = vmatpush.bf16.msrb.mxu1 %v1121_v49  ;;  %v1389_v41 = vld [vmem:[#allocation5 + $0x154] sm:$0xf] }
  0x22   :  { %365 = vmatpush.bf16.msra.mxu2 %v1053_v5 }
  0x23   :  { %378 = vmatpush.bf16.msra.mxu3 %v1117_v47  ;;  %v1380_v47 = vld [vmem:[#allocation5 + $0x104] sm:$0xf0] }
  0x24   :  { %388 = vmatpush.bf16.msrb.mxu0 %v1081_v51  ;;  %v1362_v51 = vld [vmem:[#allocation5 + $0x94] sm:$0xf0]  ;;  %v1194_v49 = vor.u32 %v1380_v47, %v1193_v46  ;;  %v1387_v47 = vld [vmem:[#allocation5 + $0x144] sm:$0xf] }
  0x28   :  { %389 = vmatpush.bf16.msrb.mxu0 %v1073_v59  ;;  %v1102_v59 = vld [vmem:[#allocation5 + $0x88] sm:$0xf0] }
  0x29   :  { %v1105_v61 = vor.u32 %v1359_v58, %v1102_v59  ;;  %v1177_v58 = vld [vmem:[#allocation5 + $0xe0] sm:$0xf]  ;;  %v1376_v59 = vld [vmem:[#allocation5 + $0xe4] sm:$0xf0] }
  0x2c   :  { %390 = vmatpush.bf16.msrb.mxu0 %v1065_v1 }
  0x30   :  { %391 = vmatpush.bf16.msrb.mxu0 %v1057_v7 }
  0x7d   :  { %v72_v15 = vpop.permute.xlu0 %71  ;;  %v1597_v25 = vpop.permute.xlu1 %105 }
  0x7e   :  { %v82_v16 = vmul.f32 %v80_v12, %v72_v15  ;;  %v81_v22 = vmul.f32 %v79_v17, %v72_v15  ;;  %v114_v29 = vmul.f32 %v112_v24, %v1597_v25  ;;  %v1045_v12 = vor.u32 %v1346_v10, %v1044_v8  ;;  %v1036_v15 = vld [vmem:[#allocation5] sm:$0xf]  ;;  %v1343_v17 = vld [vmem:[#allocation5 + $0x4] sm:$0xf] }
  0x7f   :  { %v115_v4 = vmul.f32 %v113_v2, %v1597_v25  ;;  %v1340_v25 = vld [vmem:[%s1746_s3 + $0x28] sm:$0xff]  ;;  %v1373_v2 = vld [vmem:[#allocation5 + $0xd4] sm:$0xf] }
  0x80   :  { %v1595_v20 = vadd.f32 %v85_v14, %v82_v16  ;;  %v88_v27 = vadd.f32 %v84_v21, %v81_v22  ;;  %v1049_v14 = vor.u32 %v1345_v11, %v1046_v13  ;;  %v1344_v16 = vld [vmem:[#allocation5 + $0x4] sm:$0xf0]  ;;  %366 = vmatpush.bf16.msra.mxu2 %v1045_v12  ;;  %v1041_v21 = vor.u32 %v1343_v17, %v1038_v19 }
  0x81   :  { %v1037_v18 = vor.u32 %v1344_v16, %v1036_v15 }
  0x82   :  { %392 = vmatpush.bf16.msrb.mxu0 %v1049_v14 }
  0x84   :  { %367 = vmatpush.bf16.msra.mxu2 %v1037_v18 }
  0x86   :  { %v1599_v26 = vpop.permute.xlu0 %91  ;;  %393 = vmatpush.bf16.msrb.mxu0 %v1041_v21 }
  0x87   :  { %v100_v28 = vmul.f32 %v98_v23, %v1599_v26  ;;  %v101_v1 = vmul.f32 %v99_v63, %v1599_v26  ;;  %v1339_v26 = vld [vmem:[%s1746_s3 + $0x20] sm:$0xff] }
  0x89   :  { %v102_v30 = vadd.f32 %v100_v28, %v88_v27  ;;  %v103_v3 = vadd.f32 %v101_v1, %v1595_v20  ;;  %v1341_v20 = vld [vmem:[%s1746_s3 + $0x30] sm:$0xff]  ;;  %v1374_v1 = vld [vmem:[#allocation5 + $0xd4] sm:$0xf0] }
  0x8b   :  { %v1603_v31 = vadd.f32 %v114_v29, %v102_v30  ;;  %v117_v5 = vadd.f32 %v115_v4, %v103_v3  ;;  %v1170_v3 = vor.u32 %v1374_v1, %v1169_v0  ;;  %v1171_v4 = vld [vmem:[#allocation5 + $0xd8] sm:$0xf0] }
  0x8d   :  { %1424 = vtanh.f32 %v1603_v31 }
  0x93   :  { %v1425_v32 = vpop.eup %1424 }
  0x94   :  { %120 = vst.msk [vmem:[#allocation2] sm:$0xff] %vm119_vm0, %v1425_v32  ;;  %v121_v33 = vpack.c.bf16 %v1425_v32, %v1425_v32  ;;  %v1616_v32 = vld [vmem:[%s1747_s4 + $0x2] sm:$0x3] }
  0x95   :  { %v233_v14 = vperm.slane %v1616_v32, 0 }
  0x96   :  { %1023 = vmatmul.msk.bf16.vlgmr.msra.gmra.mxu0 %vm119_vm0, %v121_v33 }
 0x113   :  { %v158_v52 = vpop.f32.mrf.mxu0 }
 0x114   :  { %163 = vrot.lane.b32.xlu1 %v158_v52, %s1500_s1  ;;  %v1361_v52 = vld [vmem:[#allocation5 + $0x94] sm:$0xf] }
 0x115   :  { %v1113_v57 = vor.u32 %v1361_v52, %v1110_v54  ;;  %v1185_v52 = vld [vmem:[#allocation5 + $0xf0] sm:$0xf]  ;;  %v1377_v54 = vld [vmem:[#allocation5 + $0xf4] sm:$0xf] }
 0x117   :  { %405 = vmatpush.bf16.msrb.mxu1 %v1113_v57  ;;  %v1190_v57 = vor.u32 %v1377_v54, %v1187_v56 }
 0x11b   :  { %v160_v53 = vpop.f32.mrf.mxu0  ;;  %406 = vmatpush.bf16.msrb.mxu1 %v1105_v61  ;;  %v1178_v61 = vor.u32 %v1376_v59, %v1177_v58  ;;  %v1368_v58 = vld [vmem:[%s1746_s3 + $0x48] sm:$0xff]  ;;  %v1367_v59 = vld [vmem:[%s1746_s3 + $0x40] sm:$0xff] }
 0x11c   :  { %v1109_v53 = vor.u32 %v1362_v51, %v1108_v50  ;;  %v1195_v50 = vld [vmem:[#allocation5 + $0x108] sm:$0xf0] }
 0x11d   :  { %v1198_v51 = vor.u32 %v1379_v48, %v1195_v50  ;;  %v1227_v48 = vld [vmem:[#allocation5 + $0x148] sm:$0xf0] }
 0x11e   :  { %379 = vmatpush.bf16.msra.mxu3 %v1109_v53  ;;  %v1378_v53 = vld [vmem:[#allocation5 + $0xf4] sm:$0xf0]  ;;  %v1230_v50 = vor.u32 %v1387_v47, %v1227_v48  ;;  %v954_v47 = vld [vmem:[#allocation4] sm:$0x1] }
 0x11f   :  { %v1186_v55 = vor.u32 %v1378_v53, %v1185_v52  ;;  %v1423_v48 = vld [vmem:[%s1751_s8] ss:$0 sm:$0xff] }
 0x122   :  { %380 = vmatpush.bf16.msra.mxu3 %v1101_v60  ;;  %v1375_v60 = vld [vmem:[#allocation5 + $0xe4] sm:$0xf] }
 0x123   :  { %v1182_v63 = vor.u32 %v1375_v60, %v1179_v62 }
 0x126   :  { %446 = vmatpush.bf16.msrb.mxu3 %v1342_v9 }
 0x12a   :  { %447 = vmatpush.bf16.msrb.mxu3 %v1341_v20 }
 0x12e   :  { %448 = vmatpush.bf16.msrb.mxu3 %v1340_v25 }
 0x132   :  { %449 = vmatpush.bf16.msrb.mxu3 %v1339_v26 }
 0x186   :  { %v164_v22 = vpop.permute.xlu1 %163 }
 0x187   :  { %v166_v23 = vadd.f32 %v164_v22, %v1603_v31  ;;  %v234_v31 = vperm.slane %v1616_v32, 1  ;;  %v1209_v32 = vld [vmem:[#allocation5 + $0x120] sm:$0xf] }
 0x189   :  { %1426 = vtanh.f32 %v166_v23 }
 0x18f   :  { %v1427_v24 = vpop.eup %1426 }
 0x190   :  { %169 = vst.msk [vmem:[#allocation2] sm:$0xff] %vm168_vm1, %v1427_v24  ;;  %v170_v27 = vpack.c.bf16 %v1427_v24, %v1427_v24  ;;  %v1217_v24 = vld [vmem:[#allocation5 + $0x130] sm:$0xf] }
 0x192   :  { %172 = vrot.lane.b32.xlu2 %v170_v27, %s1500_s1  ;;  %v1386_v27 = vld [vmem:[#allocation5 + $0x134] sm:$0xf0] }
 0x197   :  { %v202_v28 = vld [vmem:[#allocation2] sm:$0xff] }
 0x198   :  { %v204_v29 = vpack.c.bf16 %v202_v28, %v202_v28  ;;  %v1385_v28 = vld [vmem:[#allocation5 + $0x134] sm:$0xf] }
 0x19a   :  { %368 = vmatmul.bf16.vlgmr.msra.gmra.mxu2 %v204_v29  ;;  %394 = vmatmul.bf16.vlgmr.msrb.gmra.mxu0 %v204_v29  ;;  %v1218_v29 = vor.u32 %v1386_v27, %v1217_v24  ;;  %v1249_v27 = vld [vmem:[#allocation5 + $0x170] sm:$0xf] }
 0x19c   :  { %653 = vmatpush.bf16.msrb.mxu2 %v1218_v29  ;;  %v1393_v29 = vld [vmem:[#allocation5 + $0x174] sm:$0xf] }
 0x1ec   :  { %v173_v30 = vpop.permute.xlu2 %172 }
 0x1ed   :  { %1024 = vmatmul.msk.bf16.vlgmr.msra.gmra.mxu1 %vm119_vm0, %v173_v30  ;;  %v1219_v30 = vld [vmem:[#allocation5 + $0x138] sm:$0xf0] }
 0x1ee   :  { %473 = vmatpush.bf16.msra.mxu1 %v1342_v9 }
 0x1f2   :  { %474 = vmatpush.bf16.msra.mxu1 %v1341_v20 }
 0x1f6   :  { %475 = vmatpush.bf16.msra.mxu1 %v1340_v25 }
 0x1fa   :  { %476 = vmatpush.bf16.msra.mxu1 %v1339_v26 }
 0x217   :  { %v395_v33 = vpop.f32.mrf.mxu0 }
 0x218   :  { %v1619_v34 = vadd.f32 %v395_v33, %v234_v31  ;;  %v1384_v31 = vld [vmem:[#allocation5 + $0x124] sm:$0xf0]  ;;  %v1222_v33 = vor.u32 %v1385_v28, %v1219_v30  ;;  %v1394_v28 = vld [vmem:[#allocation5 + $0x174] sm:$0xf0] }
 0x219   :  { %v1250_v30 = vor.u32 %v1394_v28, %v1249_v27  ;;  %v1406_v27 = vld [vmem:[%s1748_s5 + $0x58] sm:$0xff]  ;;  %v1405_v28 = vld [vmem:[%s1748_s5 + $0x50] sm:$0xff] }
 0x21a   :  { %679 = vmatpush.bf16.msra.mxu0 %v1222_v33  ;;  %v1241_v33 = vld [vmem:[#allocation5 + $0x160] sm:$0xf] }
 0x21d   :  { %v1621_v35 = vpop.f32.mrf.mxu2 }
 0x21e   :  { %v370_v16 = vadd.f32 %v1621_v35, %v233_v14  ;;  %v1211_v35 = vld [vmem:[#allocation5 + $0x128] sm:$0xf0] }
 0x21f   :  { %v397_v36 = vpop.f32.mrf.mxu0 }
 0x220   :  { %v1210_v36 = vor.u32 %v1384_v31, %v1209_v32  ;;  %v1251_v32 = vld [vmem:[#allocation5 + $0x178] sm:$0xf0] }
 0x221   :  { %v1254_v31 = vor.u32 %v1393_v29, %v1251_v32  ;;  %v1404_v29 = vld [vmem:[%s1748_s5 + $0x48] sm:$0xff] }
 0x222   :  { %654 = vmatpush.bf16.msrb.mxu2 %v1210_v36 }
 0x225   :  { %v371_v37 = vpop.f32.mrf.mxu2 }
 0x226   :  { %655 = vmatpush.bf16.msrb.mxu2 %v1202_v42  ;;  %v1234_v42 = vor.u32 %v1390_v40, %v1233_v39  ;;  %v1407_v39 = vld [vmem:[%s1750_s7] sm:$0xff] }
 0x227   :  { %v1422_v40 = vld [vmem:[%s1749_s6] ss:$0 sm:$0xff] }
 0x22a   :  { %656 = vmatpush.bf16.msrb.mxu2 %v1194_v49 }
 0x22e   :  { %657 = vmatpush.bf16.msrb.mxu2 %v1186_v55 }
 0x232   :  { %658 = vmatpush.bf16.msrb.mxu2 %v1178_v61 }
 0x236   :  { %659 = vmatpush.bf16.msrb.mxu2 %v1170_v3 }
 0x26a   :  { %v186_v6 = vpop.f32.mrf.mxu1 }
 0x26b   :  { %v190_v7 = vadd.f32 %v186_v6, %v117_v5  ;;  %v1174_v5 = vor.u32 %v1373_v2, %v1171_v4  ;;  %v1161_v6 = vld [vmem:[#allocation5 + $0xc0] sm:$0xf] }
 0x26d   :  { %1428 = vtanh.f32 %v190_v7  ;;  %v1372_v7 = vld [vmem:[#allocation5 + $0xc4] sm:$0xf0] }
 0x272   :  { %v188_v8 = vpop.f32.mrf.mxu1 }
 0x273   :  { %v1429_v10 = vpop.eup %1428  ;;  %v1371_v8 = vld [vmem:[#allocation5 + $0xc4] sm:$0xf] }
 0x274   :  { %192 = vst.msk [vmem:[#allocation2 + $0x8] sm:$0xff] %vm119_vm0, %v1429_v10  ;;  %v1162_v10 = vor.u32 %v1372_v7, %v1161_v6  ;;  %v1402_v6 = vld [vmem:[%s1748_s5 + $0x38] sm:$0xff]  ;;  %v1401_v7 = vld [vmem:[%s1748_s5 + $0x30] sm:$0xff] }
 0x276   :  { %660 = vmatpush.bf16.msrb.mxu2 %v1162_v10 }
 0x27a   :  { %887 = vmatpush.bf16.msra.mxu2 %v1402_v6 }
 0x27b   :  { %v203_v11 = vld [vmem:[#allocation2 + $0x8] sm:$0xff] }
 0x27c   :  { %v205_v12 = vpack.c.bf16 %v203_v11, %v203_v11  ;;  %v1163_v11 = vld [vmem:[#allocation5 + $0xc8] sm:$0xf0] }
 0x27e   :  { %1130 = vmatmul.msk.bf16.vlgmr.msra.gmra.mxu3 %vm119_vm0, %v205_v12  ;;  %1131 = vmatmul.msk.bf16.vlgmr.msrb.gmra.mxu1 %vm119_vm0, %v205_v12  ;;  %v1166_v12 = vor.u32 %v1371_v8, %v1163_v11  ;;  %v1400_v8 = vld [vmem:[%s1748_s5 + $0x28] sm:$0xff] }
 0x27f   :  { %670 = vmatpush.bf16.msra.mxu3 %v1250_v30  ;;  %696 = vmatpush.bf16.msrb.mxu1 %v1254_v31  ;;  %v1403_v30 = vld [vmem:[%s1748_s5 + $0x40] sm:$0xff] }
 0x280   :  { %888 = vmatpush.bf16.msra.mxu2 %v1401_v7 }
 0x284   :  { %889 = vmatpush.bf16.msra.mxu2 %v1400_v8 }
 0x2fb   :  { %v408_v13 = vpop.f32.mrf.mxu1 }
 0x2fc   :  { %v1645_v15 = vadd.f32 %v408_v13, %v1619_v34  ;;  %v1383_v34 = vld [vmem:[#allocation5 + $0x124] sm:$0xf] }
 0x2fd   :  { %v1214_v37 = vor.u32 %v1383_v34, %v1211_v35  ;;  %v1392_v34 = vld [vmem:[#allocation5 + $0x164] sm:$0xf0]  ;;  %v1391_v35 = vld [vmem:[#allocation5 + $0x164] sm:$0xf] }
 0x2fe   :  { %v1242_v36 = vor.u32 %v1392_v34, %v1241_v33 }
 0x2ff   :  { %680 = vmatpush.bf16.msra.mxu0 %v1214_v37  ;;  %v1243_v37 = vld [vmem:[#allocation5 + $0x168] sm:$0xf0] }
 0x300   :  { %v1246_v38 = vor.u32 %v1391_v35, %v1243_v37  ;;  %671 = vmatpush.bf16.msra.mxu3 %v1242_v36 }
 0x301   :  { %v382_v17 = vpop.f32.mrf.mxu3 }
 0x302   :  { %v1648_v18 = vadd.f32 %v382_v17, %v370_v16  ;;  %v1661_v17 = vld [vmem:[%s1747_s4 + $0x4] sm:$0x3]  ;;  %697 = vmatpush.bf16.msrb.mxu1 %v1246_v38  ;;  %v1408_v38 = vld [vmem:[%s1750_s7 + $0x8] sm:$0xff] }
 0x303   :  { %v410_v19 = vpop.f32.mrf.mxu1  ;;  %681 = vmatpush.bf16.msra.mxu0 %v1206_v43  ;;  %v1235_v43 = vld [vmem:[#allocation5 + $0x158] sm:$0xf0]  ;;  %v526_v61 = vperm.slane %v1661_v17, 0 }
 0x304   :  { %1430 = vtanh.f32 %v1648_v18  ;;  %v1238_v46 = vor.u32 %v1389_v41, %v1235_v43  ;;  %672 = vmatpush.bf16.msra.mxu3 %v1234_v42 }
 0x306   :  { %698 = vmatpush.bf16.msrb.mxu1 %v1238_v46 }
 0x307   :  { %682 = vmatpush.bf16.msra.mxu0 %v1198_v51 }
 0x309   :  { %v384_v21 = vpop.f32.mrf.mxu3 }
 0x30a   :  { %v1431_v22 = vpop.eup %1430  ;;  %699 = vmatpush.bf16.msrb.mxu1 %v1230_v50 }
 0x30b   :  { %413 = vst.msk [vmem:[#allocation3] sm:$0xff] %vm119_vm0, %v1431_v22  ;;  %v414_v23 = vpack.c.bf16 %v1431_v22, %v1431_v22  ;;  %683 = vmatpush.bf16.msra.mxu0 %v1190_v57  ;;  %v1370_v57 = vld [vmem:[%s1746_s3 + $0x58] sm:$0xff] }
 0x30d   :  { %1148 = vmatmul.msk.bf16.vlgmr.msrb.gmra.mxu3 %vm119_vm0, %v414_v23 }
 0x30f   :  { %684 = vmatpush.bf16.msra.mxu0 %v1182_v63 }
 0x313   :  { %685 = vmatpush.bf16.msra.mxu0 %v1174_v5 }
 0x317   :  { %686 = vmatpush.bf16.msra.mxu0 %v1166_v12  ;;  %v1399_v12 = vld [vmem:[%s1748_s5 + $0x20] sm:$0xff] }
 0x318   :  { %890 = vmatpush.bf16.msra.mxu2 %v1399_v12 }
 0x31b   :  { %945 = vmatpush.bf16.msrb.mxu0 %v1408_v38 }
 0x31f   :  { %946 = vmatpush.bf16.msrb.mxu0 %v1407_v39 }
 0x390   :  { %v451_v44 = vpop.f32.mrf.mxu3 }
 0x391   :  { %456 = vrot.lane.b32.xlu2 %v451_v44, %s1500_s1  ;;  %v1225_v44 = vld [vmem:[#allocation5 + $0x140] sm:$0xf] }
 0x398   :  { %v453_v45 = vpop.f32.mrf.mxu3 }
 0x399   :  { %v1388_v45 = vld [vmem:[#allocation5 + $0x144] sm:$0xf0] }
 0x39a   :  { %v1226_v49 = vor.u32 %v1388_v45, %v1225_v44 }
 0x39c   :  { %673 = vmatpush.bf16.msra.mxu3 %v1226_v49 }
 0x3a0   :  { %739 = vmatpush.bf16.msrb.mxu3 %v1370_v57 }
 0x3eb   :  { %v457_v9 = vpop.permute.xlu2 %456 }
 0x3ec   :  { %v459_v20 = vadd.f32 %v457_v9, %v1648_v18  ;;  %v527_v18 = vperm.slane %v1661_v17, 1  ;;  %v1398_v9 = vld [vmem:[%s1748_s5 + $0x18] sm:$0xff] }
 0x3ed   :  { %891 = vmatpush.bf16.msra.mxu2 %v1398_v9 }
 0x3ee   :  { %1432 = vtanh.f32 %v459_v20  ;;  %v1397_v20 = vld [vmem:[%s1748_s5 + $0x10] sm:$0xff] }
 0x3f1   :  { %892 = vmatpush.bf16.msra.mxu2 %v1397_v20 }
 0x3f4   :  { %v1433_v25 = vpop.eup %1432 }
 0x3f5   :  { %461 = vst.msk [vmem:[#allocation3] sm:$0xff] %vm168_vm1, %v1433_v25  ;;  %v462_v26 = vpack.c.bf16 %v1433_v25, %v1433_v25  ;;  %v1396_v25 = vld [vmem:[%s1748_s5 + $0x8] sm:$0xff] }
 0x3f6   :  { %893 = vmatpush.bf16.msra.mxu2 %v1396_v25 }
 0x3f7   :  { %464 = vrot.lane.b32.xlu1 %v462_v26, %s1500_s1  ;;  %v1395_v26 = vld [vmem:[%s1748_s5] sm:$0xff] }
 0x3fa   :  { %894 = vmatpush.bf16.msra.mxu2 %v1395_v26 }
 0x3fc   :  { %v494_v13 = vld [vmem:[#allocation3] sm:$0xff] }
 0x3fd   :  { %v496_v14 = vpack.c.bf16 %v494_v13, %v494_v13 }
 0x3ff   :  { %661 = vmatmul.bf16.vlgmr.msrb.gmra.mxu2 %v496_v14  ;;  %687 = vmatmul.bf16.vlgmr.msra.gmra.mxu0 %v496_v14 }
 0x400   :  { %957 = vperm.xlu1 %1420, %v954_v47  }
 0x469   :  { %v465_v16 = vpop.permute.xlu1 %464 }
 0x46a   :  { %1149 = vmatmul.msk.bf16.vlgmr.msra.gmra.mxu1 %vm119_vm0, %v465_v16 }
 0x46b   :  { %766 = vmatpush.bf16.msra.mxu1 %v1370_v57 }
 0x47c   :  { %v688_v19 = vpop.f32.mrf.mxu0 }
 0x47d   :  { %v689_v21 = vadd.f32 %v688_v19, %v527_v18 }
 0x482   :  { %v662_v22 = vpop.f32.mrf.mxu2 }
 0x483   :  { %v663_v63 = vadd.f32 %v662_v22, %v526_v61 }
 0x484   :  { %v690_v23 = vpop.f32.mrf.mxu0 }
 0x48a   :  { %v664_v24 = vpop.f32.mrf.mxu2 }
 0x4e7   :  { %v478_v51 = vpop.f32.mrf.mxu1 }
 0x4e8   :  { %v482_v52 = vadd.f32 %v478_v51, %v1645_v15  ;;  %v1369_v15 = vld [vmem:[%s1746_s3 + $0x50] sm:$0xff] }
 0x4e9   :  { %740 = vmatpush.bf16.msrb.mxu3 %v1369_v15  ;;  %767 = vmatpush.bf16.msra.mxu1 %v1369_v15 }
 0x4ea   :  { %1434 = vtanh.f32 %v482_v52  ;;  %v953_v52 = vld [vmem:[%s1752_s9] sm:$0x1] }
 0x4ed   :  { %741 = vmatpush.bf16.msrb.mxu3 %v1368_v58  ;;  %768 = vmatpush.bf16.msra.mxu1 %v1368_v58 }
 0x4ef   :  { %v480_v53 = vpop.f32.mrf.mxu1 }
 0x4f0   :  { %v1435_v54 = vpop.eup %1434 }
 0x4f1   :  { %484 = vst.msk [vmem:[#allocation3 + $0x8] sm:$0xff] %vm119_vm0, %v1435_v54  ;;  %742 = vmatpush.bf16.msrb.mxu3 %v1367_v59  ;;  %769 = vmatpush.bf16.msra.mxu1 %v1367_v59  ;;  %v958_v54 = vpop.permute.xlu1 %957 }
 0x4f8   :  { %v495_v55 = vld [vmem:[#allocation3 + $0x8] sm:$0xff] }
 0x4f9   :  { %v497_v56 = vpack.c.bf16 %v495_v55, %v495_v55  ;;  %v960_v55 = vperm.slane %v958_v54, 0 }
 0x4fb   :  { %1255 = vmatmul.msk.bf16.vlgmr.msra.gmra.mxu3 %vm119_vm0, %v497_v56  ;;  %1256 = vmatmul.msk.bf16.vlgmr.msrb.gmra.mxu1 %vm119_vm0, %v497_v56 }
 0x4fc   :  { %904 = vmatpush.bf16.msra.mxu3 %v1406_v27 }
 0x500   :  { %905 = vmatpush.bf16.msra.mxu3 %v1405_v28 }
 0x504   :  { %906 = vmatpush.bf16.msra.mxu3 %v1404_v29 }
 0x508   :  { %907 = vmatpush.bf16.msra.mxu3 %v1403_v30 }
 0x578   :  { %v701_v60 = vpop.f32.mrf.mxu1 }
 0x579   :  { %v702_v62 = vadd.f32 %v701_v60, %v689_v21 }
 0x57e   :  { %v675_v0 = vpop.f32.mrf.mxu3 }
 0x57f   :  { %v676_v1 = vadd.f32 %v675_v0, %v663_v63 }
 0x580   :  { %v703_v2 = vpop.f32.mrf.mxu1 }
 0x581   :  { %1436 = vtanh.f32 %v676_v1 }
 0x586   :  { %v677_v3 = vpop.f32.mrf.mxu3 }
 0x587   :  { %v1437_v4 = vpop.eup %1436 }
 0x588   :  { %v707_v5 = vpack.c.bf16 %v1437_v4, %v1437_v4  ;;  %706 = vst.msk [vmem:[#allocation2] sm:$0xff] %vm119_vm0, %v1437_v4 }
 0x58a   :  { %1273 = vmatmul.msk.bf16.vlgmr.msrb.gmra.mxu3 %vm119_vm0, %v707_v5 }
 0x60d   :  { %v744_v10 = vpop.f32.mrf.mxu3 }
 0x60e   :  { %749 = vrot.lane.b32.xlu2 %v744_v10, %s1500_s1 }
 0x615   :  { %v746_v11 = vpop.f32.mrf.mxu3 }
 0x668   :  { %v750_v13 = vpop.permute.xlu2 %749 }
 0x669   :  { %v752_v14 = vadd.f32 %v750_v13, %v676_v1 }
 0x66b   :  { %1438 = vtanh.f32 %v752_v14 }
 0x671   :  { %v1439_v16 = vpop.eup %1438 }
 0x672   :  { %754 = vst.msk [vmem:[#allocation2] sm:$0xff] %vm168_vm1, %v1439_v16  ;;  %v755_v17 = vpack.c.bf16 %v1439_v16, %v1439_v16 }
 0x674   :  { %757 = vrot.lane.b32.xlu0 %v755_v17, %s1500_s1 }
 0x679   :  { %v778_v18 = vld [vmem:[#allocation2] sm:$0xff] }
 0x67a   :  { %v780_v19 = vmax.f32 %v778_v18, 0.0 }
 0x67c   :  { %v782_v21 = vpack.c.bf16 %v780_v19, %v780_v19 }
 0x67e   :  { %895 = vmatmul.bf16.vlgmr.msra.gmra.mxu2 %v782_v21 }
 0x6e6   :  { %v758_v22 = vpop.permute.xlu0 %757 }
 0x6e7   :  { %1274 = vmatmul.msk.bf16.vlgmr.msra.gmra.mxu1 %vm119_vm0, %v758_v22 }
 0x701   :  { %v896_v23 = vpop.f32.mrf.mxu2 }
 0x702   :  { %v897_v41 = vadd.f32 %v1422_v40, %v896_v23 }
 0x709   :  { %v898_v24 = vpop.f32.mrf.mxu2 }
 0x764   :  { %v771_v32 = vpop.f32.mrf.mxu1 }
 0x765   :  { %v775_v31 = vadd.f32 %v771_v32, %v702_v62 }
 0x767   :  { %1440 = vtanh.f32 %v775_v31 }
 0x76c   :  { %v773_v33 = vpop.f32.mrf.mxu1 }
 0x76d   :  { %v1441_v34 = vpop.eup %1440 }
 0x76e   :  { %777 = vst.msk [vmem:[#allocation2 + $0x8] sm:$0xff] %vm119_vm0, %v1441_v34 }
 0x775   :  { %v779_v35 = vld [vmem:[#allocation2 + $0x8] sm:$0xff] }
 0x776   :  { %v781_v36 = vmax.f32 %v779_v35, 0.0 }
 0x778   :  { %v783_v37 = vpack.c.bf16 %v781_v36, %v781_v36 }
 0x77a   :  { %1323 = vmatmul.msk.bf16.vlgmr.msra.gmra.mxu3 %vm119_vm0, %v783_v37 }
 0x7fd   :  { %v909_v42 = vpop.f32.mrf.mxu3 }
 0x7fe   :  { %v910_v43 = vadd.f32 %v909_v42, %v897_v41 }
 0x800   :  { %v913_v44 = vmax.f32 %v910_v43, 0.0 }
 0x802   :  { %v914_v45 = vpack.c.bf16 %v913_v44, %v913_v44 }
 0x804   :  { %1332 = vmatmul.msk.bf16.vlgmr.msrb.gmra.mxu0 %vm935_vm2, %v914_v45 }
 0x805   :  { %v911_v46 = vpop.f32.mrf.mxu3 }
 0x881   :  { %v948_v49 = vpop.f32.mrf.mxu0 }
 0x882   :  { %v949_v50 = vadd.f32 %v1423_v48, %v948_v49 }
 0x884   :  { %v952_v51 = vmax.f32 %v949_v50, 0.0 }
 0x886   :  { %1333 = vmatpush.xpose.msk.msrb.mxu1 %vm961_vm3, %v952_v51 }
 0x889   :  { %v950_v53 = vpop.f32.mrf.mxu0  ;;  %1334 = vmatmul.msk.f32.vlgmr.msrb.gmra.mxu1 %vm961_vm3, %v953_v52 }
 0x906   :  { %v985_v56 = vpop.f32.mrf.mxu1 }
 0x907   :  { %v986_v57 = vadd.f32 %v985_v56, %v960_v55 }
 0x909   :  { %989 = vst.msk [vmem:[#allocation8] sm:$0x1] %vm988_vm4, %v986_v57 }
 0x90a   :  { %1000 = dma.vmem_to_hbm [thread:$0]  %s996_s21, 16, %s998_s24, [#allocation7]  }
 0x90b   :  { %1492 = dma.done.wait [#allocation7], 16  }
 0x90c   :  { %1493 = vsyncadd [#allocation7], 4294967280 }
 0x90d   :  { %1005 = vsyncpa [#allocation6], 1 }
 0x90e   :  { %1006 = vsyncpa [#allocation7], 1 }

</bundles_post_ra>
